<compile_context>
chip_gen: v7x
topology: tpu7x:2x2x1
jax: 0.10.0
libtpu: 0.0.40
codegen_flags: <defaults>
</compile_context>

<pallas_src>
import math

import jax
import jax.numpy as jnp
from jax.experimental import pallas as pl
from jax.experimental.pallas import tpu as pltpu


_GELU_C = math.sqrt(2.0 / math.pi)


def _round_up(n, m):
    return ((n + m - 1) // m) * m


def _ffn_kernel(x_ref, w1_ref, b1_ref, w2_ref, b2_ref, o_ref, acc_ref):
    k = pl.program_id(1)

    @pl.when(k == 0)
    def _():
        acc_ref[...] = jnp.zeros_like(acc_ref)

    # h_chunk = x @ W1[:, k-chunk] + b1[k-chunk]   (f32 accumulation on the MXU)
    h = jnp.dot(x_ref[...], w1_ref[...], preferred_element_type=jnp.float32)
    h = h + b1_ref[...].astype(jnp.float32)

    # GELU, tanh approximation exactly as the reference module (elementwise, so
    # applying it per d_ff chunk is exact).
    g = 0.5 * h * (1.0 + jnp.tanh(_GELU_C * (h + 0.044715 * h * h * h)))

    # acc += g_chunk @ W2[k-chunk, :]  (operands in weight dtype, f32 accumulate)
    acc_ref[...] += jnp.dot(g.astype(w2_ref.dtype), w2_ref[...],
                            preferred_element_type=jnp.float32)

    @pl.when(k == pl.num_programs(1) - 1)
    def _():
        o_ref[...] = (acc_ref[...] + b2_ref[...].astype(jnp.float32)).astype(o_ref.dtype)


def positionwise_feed_forward(x, w1, b1, w2, b2, *, row_tile=256, k_tile=512):
    """x: (..., d_model). w1: (d_model, d_ff), b1: (d_ff,),
       w2: (d_ff, d_model), b2: (d_model,).  Weights are (in, out) — the
       transpose of nn.Linear.weight."""
    orig_shape = x.shape
    d_model = orig_shape[-1]
    d_ff = w1.shape[1]
    assert w1.shape == (d_model, d_ff), "w1 must be (d_model, d_ff)"
    assert w2.shape == (d_ff, d_model), "w2 must be (d_ff, d_model)"

    x2d = x.reshape(-1, d_model)
    n_rows = x2d.shape[0]

    # --- row tiling: sublane-aligned tile, pad ragged row counts -------------
    sub = 16 if x.dtype == jnp.bfloat16 else 8
    tm = max(sub, min(_round_up(row_tile, sub), _round_up(n_rows, sub)))
    rows_p = _round_up(n_rows, tm)
    if rows_p != n_rows:
        x2d = jnp.pad(x2d, ((0, rows_p - n_rows), (0, 0)))

    # --- d_ff tiling: fully resident if small, else 128-aligned chunks -------
    if d_ff <= k_tile:
        tk = d_ff
        dff_p = d_ff
    else:
        tk = _round_up(k_tile, 128)
        dff_p = _round_up(d_ff, tk)
    if dff_p != d_ff:
        # Zero padding is exact: padded h columns are 0, GELU(0) = 0, and the
        # padded W2 rows are 0 so they contribute nothing to the output.
        w1 = jnp.pad(w1, ((0, 0), (0, dff_p - d_ff)))
        b1 = jnp.pad(b1, ((0, dff_p - d_ff),))
        w2 = jnp.pad(w2, ((0, dff_p - d_ff), (0, 0)))

    b1_2d = b1.reshape(1, dff_p)
    b2_2d = b2.reshape(1, d_model)

    grid = (rows_p // tm, dff_p // tk)

    # --- VMEM budget: double-buffered pipeline blocks + f32 accumulator ------
    itm = x2d.dtype.itemsize
    itw = w1.dtype.itemsize
    vmem_needed = (
        2 * tm * d_model * itm          # x tiles
        + 2 * d_model * tk * itw        # W1 chunks
        + 2 * tk * d_model * itw        # W2 chunks
        + 2 * (tk + d_model) * itw      # biases
        + 2 * tm * d_model * itm        # out tiles
        + tm * d_model * 4              # f32 accumulator scratch
    )
    vmem_limit = int(min(100 * 1024 * 1024,
                         max(32 * 1024 * 1024, 1.5 * vmem_needed)))

    cost = pl.CostEstimate(
        flops=int(4 * rows_p * d_model * dff_p),
        transcendentals=int(rows_p * dff_p),
        bytes_accessed=int(2 * rows_p * d_model * itm
                           + 2 * d_model * dff_p * itw * grid[0]),
    )

    out = pl.pallas_call(
        _ffn_kernel,
        out_shape=jax.ShapeDtypeStruct((rows_p, d_model), x.dtype),
        grid_spec=pltpu.PrefetchScalarGridSpec(
            num_scalar_prefetch=0,
            grid=grid,
            in_specs=[
                pl.BlockSpec((tm, d_model), lambda i, k: (i, 0)),   # x row tile
                pl.BlockSpec((d_model, tk), lambda i, k: (0, k)),   # W1 chunk
                pl.BlockSpec((1, tk), lambda i, k: (0, k)),         # b1 chunk
                pl.BlockSpec((tk, d_model), lambda i, k: (k, 0)),   # W2 chunk
                pl.BlockSpec((1, d_model), lambda i, k: (0, 0)),    # b2
            ],
            out_specs=pl.BlockSpec((tm, d_model), lambda i, k: (i, 0)),
            scratch_shapes=[pltpu.VMEM((tm, d_model), jnp.float32)],
        ),
        compiler_params=pltpu.CompilerParams(
            dimension_semantics=("parallel", "arbitrary"),
            vmem_limit_bytes=vmem_limit,
        ),
        cost_estimate=cost,
    )(x2d, w1, b1_2d, w2, b2_2d)

    return out[:n_rows].reshape(orig_shape)


def init_params(key, d_model, d_ff, dtype=jnp.float32):
    """Deterministic init mimicking nn.Linear's default U(-1/sqrt(fan_in), +)."""
    k1, k2, k3, k4 = jax.random.split(key, 4)
    lim1 = 1.0 / math.sqrt(d_model)
    lim2 = 1.0 / math.sqrt(d_ff)
    # Stored pre-transposed: (in_features, out_features)
    w1 = jax.random.uniform(k1, (d_model, d_ff), dtype, -lim1, lim1)
    b1 = jax.random.uniform(k2, (d_ff,), dtype, -lim1, lim1)
    w2 = jax.random.uniform(k3, (d_ff, d_model), dtype, -lim2, lim2)
    b2 = jax.random.uniform(k4, (d_model,), dtype, -lim2, lim2)
    return w1, b1, w2, b2


def _reference_ffn(x, w1, b1, w2, b2):
    h = x.astype(jnp.float32) @ w1.astype(jnp.float32) + b1.astype(jnp.float32)
    g = 0.5 * h * (1.0 + jnp.tanh(_GELU_C * (h + 0.044715 * h ** 3)))
    return (g @ w2.astype(jnp.float32) + b2.astype(jnp.float32)).astype(x.dtype)


if __name__ == "__main__":
    key = jax.random.PRNGKey(0)
    kx, kp = jax.random.split(key)

    batch, seq, d_model, d_ff = 2, 8, 32, 64
    x = jax.random.normal(kx, (batch, seq, d_model), jnp.float32)
    w1, b1, w2, b2 = init_params(kp, d_model, d_ff)

    y = positionwise_feed_forward(x, w1, b1, w2, b2)
    y = jax.block_until_ready(y)
    y_ref = _reference_ffn(x, w1, b1, w2, b2)
    assert y.shape == x.shape
    assert jnp.allclose(y, y_ref, atol=1e-5, rtol=1e-5), "mismatch vs reference"

    # Ragged row count (15 rows) exercises the row-padding path.
    x2 = jax.random.normal(jax.random.PRNGKey(1), (3, 5, d_model), jnp.float32)
    y2 = jax.block_until_ready(positionwise_feed_forward(x2, w1, b1, w2, b2))
    assert jnp.allclose(y2, _reference_ffn(x2, w1, b1, w2, b2),
                        atol=1e-5, rtol=1e-5), "mismatch vs reference (padded rows)"

    print("KERNEL_OK")
</pallas_src>

<mosaic_0001>
module attributes {stable_mosaic.version = 11 : i64} {
  func.func @_ffn_kernel(%arg0: i32, %arg1: i32, %arg2: memref<16x32xf32, #tpu.memory_space<vmem>>, %arg3: memref<32x64xf32, #tpu.memory_space<vmem>>, %arg4: memref<1x64xf32, #tpu.memory_space<vmem>>, %arg5: memref<64x32xf32, #tpu.memory_space<vmem>>, %arg6: memref<1x32xf32, #tpu.memory_space<vmem>>, %arg7: memref<16x32xf32, #tpu.memory_space<vmem>>, %arg8: memref<16x32xf32, #tpu.memory_space<vmem>>) attributes {dimension_semantics = [#tpu.dimension_semantics<parallel>, #tpu.dimension_semantics<arbitrary>], iteration_bounds = array<i64: 1, 1>, scalar_prefetch = 0 : i64, scratch_operands = 1 : i64, tpu.core_type = #tpu.core_type<tc>, window_params = [{transform_indices = @transform_0, window_bounds = array<i64: 16, 32>}, {transform_indices = @transform_1, window_bounds = array<i64: 32, 64>}, {transform_indices = @transform_2, window_bounds = array<i64: 1, 64>}, {transform_indices = @transform_3, window_bounds = array<i64: 64, 32>}, {pipeline_mode = #tpu.pipeline_mode<synchronous>, transform_indices = @transform_4, window_bounds = array<i64: 1, 32>}, {transform_indices = @transform_5, window_bounds = array<i64: 16, 32>}]} {
    %c0_i32 = arith.constant 0 : i32
    %0 = arith.cmpi eq, %arg1, %c0_i32 : i32
    %1 = arith.extui %0 : i1 to i32
    %c0_i32_0 = arith.constant 0 : i32
    %2 = arith.cmpi ne, %1, %c0_i32_0 : i32
    scf.if %2 {
      %cst_19 = arith.constant 0.000000e+00 : f32
      %30 = vector.broadcast %cst_19 : f32 to vector<16x32xf32>
      %c0_20 = arith.constant 0 : index
      %c0_21 = arith.constant 0 : index
      %31 = vector.load %arg8[%c0_20, %c0_21] : memref<16x32xf32, #tpu.memory_space<vmem>>, vector<16x32xf32>
      tpu.vector_store %arg8[%c0_20, %c0_21], %30 {strides = array<i32>} : memref<16x32xf32, #tpu.memory_space<vmem>>, vector<16x32xf32>,
    } else {
    }
    %c0 = arith.constant 0 : index
    %c0_1 = arith.constant 0 : index
    %3 = vector.load %arg2[%c0, %c0_1] : memref<16x32xf32, #tpu.memory_space<vmem>>, vector<16x32xf32>
    %c0_2 = arith.constant 0 : index
    %c0_3 = arith.constant 0 : index
    %4 = vector.load %arg3[%c0_2, %c0_3] : memref<32x64xf32, #tpu.memory_space<vmem>>, vector<32x64xf32>
    %cst = arith.constant dense<0.000000e+00> : vector<16x64xf32>
    %5 = tpu.matmul %3, %4, %cst {dimension_numbers = #tpu.dot_dimension_numbers<[1], [0], [0], [1], [0, 0, 1, 1], [], []>} : vector<16x32xf32>, vector<32x64xf32>, vector<16x64xf32> -> vector<16x64xf32>
    %c0_4 = arith.constant 0 : index
    %c0_5 = arith.constant 0 : index
    %6 = vector.load %arg4[%c0_4, %c0_5] : memref<1x64xf32, #tpu.memory_space<vmem>>, vector<1x64xf32>
    %7 = vector.broadcast %6 : vector<1x64xf32> to vector<16x64xf32>
    %8 = arith.addf %5, %7 : vector<16x64xf32>
    %cst_6 = arith.constant 5.000000e-01 : f32
    %9 = vector.broadcast %cst_6 : f32 to vector<16x64xf32>
    %10 = arith.mulf %9, %8 : vector<16x64xf32>
    %cst_7 = arith.constant 4.471500e-02 : f32
    %11 = vector.broadcast %cst_7 : f32 to vector<16x64xf32>
    %12 = arith.mulf %11, %8 : vector<16x64xf32>
    %13 = arith.mulf %12, %8 : vector<16x64xf32>
    %14 = arith.mulf %13, %8 : vector<16x64xf32>
    %15 = arith.addf %8, %14 : vector<16x64xf32>
    %cst_8 = arith.constant 0.797884583 : f32
    %16 = vector.broadcast %cst_8 : f32 to vector<16x64xf32>
    %17 = arith.mulf %16, %15 : vector<16x64xf32>
    %18 = math.tanh %17 : vector<16x64xf32>
    %cst_9 = arith.constant 1.000000e+00 : f32
    %19 = vector.broadcast %cst_9 : f32 to vector<16x64xf32>
    %20 = arith.addf %19, %18 : vector<16x64xf32>
    %21 = arith.mulf %10, %20 : vector<16x64xf32>
    %c0_10 = arith.constant 0 : index
    %c0_11 = arith.constant 0 : index
    %22 = vector.load %arg8[%c0_10, %c0_11] : memref<16x32xf32, #tpu.memory_space<vmem>>, vector<16x32xf32>
    %c0_12 = arith.constant 0 : index
    %c0_13 = arith.constant 0 : index
    %23 = vector.load %arg5[%c0_12, %c0_13] : memref<64x32xf32, #tpu.memory_space<vmem>>, vector<64x32xf32>
    %cst_14 = arith.constant dense<0.000000e+00> : vector<16x32xf32>
    %24 = tpu.matmul %21, %23, %cst_14 {dimension_numbers = #tpu.dot_dimension_numbers<[1], [0], [0], [1], [0, 0, 1, 1], [], []>} : vector<16x64xf32>, vector<64x32xf32>, vector<16x32xf32> -> vector<16x32xf32>
    %25 = arith.addf %22, %24 : vector<16x32xf32>
    %c0_15 = arith.constant 0 : index
    %c0_16 = arith.constant 0 : index
    %26 = vector.load %arg8[%c0_15, %c0_16] : memref<16x32xf32, #tpu.memory_space<vmem>>, vector<16x32xf32>
    tpu.vector_store %arg8[%c0_15, %c0_16], %25 {strides = array<i32>} : memref<16x32xf32, #tpu.memory_space<vmem>>, vector<16x32xf32>,
    %c0_i32_17 = arith.constant 0 : i32
    %27 = arith.cmpi eq, %arg1, %c0_i32_17 : i32
    %28 = arith.extui %27 : i1 to i32
    %c0_i32_18 = arith.constant 0 : i32
    %29 = arith.cmpi ne, %28, %c0_i32_18 : i32
    scf.if %29 {
      %c0_19 = arith.constant 0 : index
      %c0_20 = arith.constant 0 : index
      %30 = vector.load %arg8[%c0_19, %c0_20] : memref<16x32xf32, #tpu.memory_space<vmem>>, vector<16x32xf32>
      %c0_21 = arith.constant 0 : index
      %c0_22 = arith.constant 0 : index
      %31 = vector.load %arg6[%c0_21, %c0_22] : memref<1x32xf32, #tpu.memory_space<vmem>>, vector<1x32xf32>
      %32 = vector.broadcast %31 : vector<1x32xf32> to vector<16x32xf32>
      %33 = arith.addf %30, %32 : vector<16x32xf32>
      %c0_23 = arith.constant 0 : index
      %c0_24 = arith.constant 0 : index
      %34 = vector.load %arg7[%c0_23, %c0_24] : memref<16x32xf32, #tpu.memory_space<vmem>>, vector<16x32xf32>
      tpu.vector_store %arg7[%c0_23, %c0_24], %33 {strides = array<i32>} : memref<16x32xf32, #tpu.memory_space<vmem>>, vector<16x32xf32>,
    } else {
    }
    return
  }
  func.func @transform_0(%arg0: i32, %arg1: i32) -> (i32, i32) {
    %c0_i32 = arith.constant 0 : i32
    %c0_i32_0 = arith.constant 0 : i32
    return %arg0, %c0_i32 : i32, i32
  }
  func.func @transform_1(%arg0: i32, %arg1: i32) -> (i32, i32) {
    %c0_i32 = arith.constant 0 : i32
    %c0_i32_0 = arith.constant 0 : i32
    return %c0_i32, %arg1 : i32, i32
  }
  func.func @transform_2(%arg0: i32, %arg1: i32) -> (i32, i32) {
    %c0_i32 = arith.constant 0 : i32
    %c0_i32_0 = arith.constant 0 : i32
    return %c0_i32, %arg1 : i32, i32
  }
  func.func @transform_3(%arg0: i32, %arg1: i32) -> (i32, i32) {
    %c0_i32 = arith.constant 0 : i32
    %c0_i32_0 = arith.constant 0 : i32
    return %arg1, %c0_i32 : i32, i32
  }
  func.func @transform_4(%arg0: i32, %arg1: i32) -> (i32, i32) {
    %c0_i32 = arith.constant 0 : i32
    %c0_i32_0 = arith.constant 0 : i32
    %c0_i32_1 = arith.constant 0 : i32
    return %c0_i32, %c0_i32_0 : i32, i32
  }
  func.func @transform_5(%arg0: i32, %arg1: i32) -> (i32, i32) {
    %c0_i32 = arith.constant 0 : i32
    %c0_i32_0 = arith.constant 0 : i32
    return %arg0, %c0_i32 : i32, i32
  }
}

</mosaic_0001>

<bundles_post_ra>
// kernel: tpu_custom_call.1
= control target key start
LH: loop header
LB: loop body
LE: loop exit
PB: predicated region body
PF: predicated region fallthrough
CT: control target
= control target key end

     0   :  { %vm25_vm0 = vcmask 261120   ;;  %s479_s0 = inlined_call_operand.vmem [shape: f32[16,32], index: 0, kind: input, shape index: {}]   ;;  %s480_s1 = inlined_call_operand.vmem [shape: f32[32,64], index: 1, kind: input, shape index: {}]   ;;  %s481_s2 = inlined_call_operand.vmem [shape: f32[1,64], index: 2, kind: input, shape index: {}]   ;;  %s482_s3 = inlined_call_operand.vmem [shape: f32[64,32], index: 3, kind: input, shape index: {}]   ;;  %s483_s4 = inlined_call_operand.vmem [shape: f32[1,32], index: 4, kind: input, shape index: {}]   ;;  %s484_s5 = inlined_call_operand.hbm [shape: f32[16,32], index: 5, kind: output, shape index: {}]  }
   0x1   :  { %v30_v0 = vld [vmem:[%s480_s1] sm:$0xff]  ;;  %v31_v1 = vld [vmem:[%s480_s1 + $0x8] sm:$0xff]  ;;  %v32_v2 = vld [vmem:[%s480_s1 + $0x10] sm:$0xff] }
   0x2   :  { %v321_v3 = vpack.c.bf16 %v31_v1, %v30_v0  ;;  %v33_v4 = vld [vmem:[%s480_s1 + $0x18] sm:$0xff]  ;;  %v28_v5 = vld [vmem:[%s479_s0] sm:$0xff] }
   0x3   :  { %v325_v6 = vpack.c.bf16 %v33_v4, %v32_v2  ;;  %299 = vmatprep.mubr.msk.f32.mxu0 %vm25_vm0, %v28_v5 }
   0x4   :  { %10 = vsyncpa [#allocation4], 0  ;;  %322 = vmatprep.subr.bf16.mxu0 %v321_v3  ;;  %v29_v7 = vld [vmem:[%s479_s0 + $0x8] sm:$0xff]  ;;  %v143_v8 = vld [vmem:[%s482_s3] sm:$0xff]  ;;  %v377_v20 = vmov 0.0   ;;  %vm151_vm1 = vcmask 523264  }
   0x5   :  { %324 = vmatpush3.bf16.msra.mxu0 %v321_v3  ;;  %v144_v9 = vld [vmem:[%s482_s3 + $0x8] sm:$0xff]  ;;  %v145_v10 = vld [vmem:[%s482_s3 + $0x10] sm:$0xff]  ;;  %v146_v12 = vld [vmem:[%s482_s3 + $0x18] sm:$0xff]  ;;  %27 = vst.msk [vmem:[#allocation2 + $0x8] sm:$0xff] %vm25_vm0, %v377_v20  ;;  %s378_s21 = smov [#allocation3]  }
   0x6   :  { %326 = vmatprep.subr.bf16.mxu0 %v325_v6  ;;  %v329_v11 = vpack.c.bf16 %v144_v9, %v143_v8  ;;  %v333_v13 = vpack.c.bf16 %v146_v12, %v145_v10  ;;  %v147_v14 = vld [vmem:[%s482_s3 + $0x20] sm:$0xff]  ;;  %v148_v15 = vld [vmem:[%s482_s3 + $0x28] sm:$0xff]  ;;  %v149_v17 = vld [vmem:[%s482_s3 + $0x30] sm:$0xff]  ;;  %26 = vst.msk [vmem:[#allocation2] sm:$0xff] %vm25_vm0, %v377_v20  ;;  %s258_s22 = sshll.u32 %s378_s21, 4  ;;  %s259_s22 = int_to_ptr.vmem [resolvable:$true] %s258_s22 }
   0x7   :  { %v337_v16 = vpack.c.bf16 %v148_v15, %v147_v14  ;;  %v150_v18 = vld [vmem:[%s482_s3 + $0x38] sm:$0xff]  ;;  %v269_v21 = vld [vmem:[%s481_s2] ss:$0 sm:$0xff]  ;;  %s353_s23 = scalar_lea.vmem %s259_s22, 256  ;;  %p358_p1 = scmp.lt.s32.totalorder %s259_s22, %s259_s22 }
   0x8   :  { %330 = vmatprep.subr.bf16.mxu1 %v329_v11  ;;  %v341_v19 = vpack.c.bf16 %v150_v18, %v149_v17  ;;  %v274_v50 = vld [vmem:[%s483_s4] ss:$0 sm:$0xff]  ;;  %p354_p0 = scmp.ne.s32.totalorder %s259_s22, %s353_s23  ;;  %p359_p2 = scmp.lt.s32.totalorder %s353_s23, %s353_s23 }
   0x9   :  { %328 = vmatpush3.bf16.msra.mxu0 %v325_v6  ;;  %332 = vmatpush3.bf16.msra.mxu1 %v329_v11 }
   0xa   :  { %334 = vmatprep.subr.bf16.mxu1 %v333_v13  ;;  %p360_p3 = por %p359_p2, %p358_p1 }
   0xc   :  { %300 = vmatmul.mubr.msk.f32.vlgmr.msra.gmra.mrb[0].mxu0 %vm25_vm0, %v29_v7  ;;  %v142_v44 = vld [vmem:[#allocation2 + $0x8] sm:$0xff]  ;;  %p361_p4 = pnand %p360_p3, %p354_p0 }
   0xd   :  { %336 = vmatpush3.bf16.msra.mxu1 %v333_v13  ;;  %v141_v45 = vld [vmem:[#allocation2] sm:$0xff] }
   0xe   :  { %338 = vmatprep.subr.bf16.mxu1 %v337_v16 }
  0x11   :  { %340 = vmatpush3.bf16.msra.mxu1 %v337_v16 }
  0x12   :  { %342 = vmatprep.subr.bf16.mxu1 %v341_v19 }
  0x15   :  { %344 = vmatpush3.bf16.msra.mxu1 %v341_v19 }
  0xdf   :  { %v301_v22 = vpop.f32.mrb[0].mxu0 }
  0xe0   :  { %v120_v23 = vadd.f32 %v301_v22, %v269_v21  ;;  %v114_v24 = vpop.f32.mrb[1].mxu0 }
  0xe1   :  { %v115_v25 = vadd.f32 %v269_v21, %v114_v24 }
  0xe2   :  { %v126_v26 = vmul.f32 0.044715, %v120_v23  ;;  %v124_v41 = vmul.f32 0.5, %v120_v23 }
  0xe3   :  { %v125_v27 = vmul.f32 0.044715, %v115_v25  ;;  %v123_v39 = vmul.f32 0.5, %v115_v25 }
  0xe4   :  { %v128_v28 = vmul.f32 %v126_v26, %v120_v23 }
  0xe5   :  { %v127_v29 = vmul.f32 %v125_v27, %v115_v25 }
  0xe6   :  { %v130_v30 = vmul.f32 %v128_v28, %v120_v23 }
  0xe7   :  { %v129_v31 = vmul.f32 %v127_v29, %v115_v25 }
  0xe8   :  { %v132_v32 = vadd.f32 %v130_v30, %v120_v23 }
  0xe9   :  { %v131_v33 = vadd.f32 %v129_v31, %v115_v25 }
  0xea   :  { %v134_v34 = vmul.f32 0.7978846, %v132_v32 }
  0xeb   :  { %v133_v35 = vmul.f32 0.7978846, %v131_v33 }
  0xec   :  { %349 = vtanh.f32 %v134_v34 }
  0xed   :  { %351 = vtanh.f32 %v133_v35 }
  0xf6   :  { %v350_v36 = vpop.eup %349 }
  0xf7   :  { %v352_v37 = vpop.eup %351  ;;  %v138_v38 = vadd.f32 1.0, %v350_v36 }
  0xf8   :  { %v137_v40 = vadd.f32 1.0, %v352_v37 }
  0xf9   :  { %v140_v43 = vmul.f32 %v138_v38, %v124_v41 }
  0xfa   :  { %v139_v42 = vmul.f32 %v137_v40, %v123_v39 }
  0xfc   :  { %318 = vmatprep.mubr.msk.f32.mxu1 %vm151_vm1, %v139_v42 }
  0xfd   :  { %319 = vmatmul.mubr.msk.f32.vlgmr.msra.gmra.mrb[0].mxu1 %vm151_vm1, %v140_v43 }
 0x1d0   :  { %v320_v46 = vpop.f32.mrb[0].mxu1 }
 0x1d1   :  { %v234_v47 = vadd.f32 %v320_v46, %v142_v44  ;;  %v224_v48 = vpop.f32.mrb[1].mxu1 }
 0x1d2   :  { %v233_v49 = vadd.f32 %v224_v48, %v141_v45 }
 0x1d3   :  { %236 = vst.msk [vmem:[#allocation2 + $0x8] sm:$0xff] %vm25_vm0, %v234_v47 }
 0x1d4   :  { %235 = vst.msk [vmem:[#allocation2] sm:$0xff] %vm25_vm0, %v233_v49 }
 0x1da   :  { %v241_v51 = vld [vmem:[#allocation2 + $0x8] sm:$0xff] }
 0x1db   :  { %v240_v52 = vld [vmem:[#allocation2] sm:$0xff]  ;;  %v250_v53 = vadd.f32 %v274_v50, %v241_v51 }
 0x1dc   :  { %v249_v54 = vadd.f32 %v274_v50, %v240_v52 }
 0x1dd   :  { %252 = vst.msk [vmem:[#allocation3 + $0x8] sm:$0xff] %vm25_vm0, %v250_v53 }
 0x1de   :  { %251 = vst.msk [vmem:[#allocation3] sm:$0xff] %vm25_vm0, %v249_v54 }
 0x1df   :  { %364 = shalt.err (!%p361_p4)
}
 0x1e0   :  { %s365_s25 = scalar_lea.hbm %s484_s5, 256 }
 0x1e1   :  { %p366_p5 = scmp.ne.s32.totalorder %s484_s5, %s365_s25  ;;  %p369_p6 = scmp.lt.u32.totalorder %s365_s25, %s484_s5 }
 0x1e3   :  { %p371_p7 = pnand %p369_p6, %p366_p5 }
 0x1e5   :  { %374 = shalt.err (!%p371_p7)
}
 0x1e6   :  { %s379_s30 = smov 128   ;;  %s380_s1 = smov 8  }
 0x1e7   :  { %264 = dma.vmem_to_hbm [thread:$0]  %s259_s22, 256, %s484_s5, [#allocation4], %s379_s30, %s379_s30, %s380_s1  }
 0x1e8   :  { %375 = dma.done.wait [#allocation4], 256  }
 0x1e9   :  { %376 = vsyncadd [#allocation4], 4294967040 }
 0x1ea   :  { %268 = vsyncpa [#allocation4], 1 }

</bundles_post_ra>
